<compile_context>
chip_gen: v7x
topology: tpu7x:2x2x1
jax: 0.10.0
libtpu: 0.0.40
codegen_flags: <defaults>
</compile_context>

<pallas_src>
import numpy as np
import jax
import jax.numpy as jnp
from jax import lax
from jax.experimental import pallas as pl
from jax.experimental.pallas import tpu as pltpu

# ----------------------------- db4 filters ----------------------------------
_DB4_DEC_LO = np.array([
    -0.010597401784997278,  0.032883011666982945,  0.030841381835986965,
    -0.187034811718881140, -0.027983769416983850,  0.630880767929590400,
     0.714846570552541500,  0.230377813308855230], dtype=np.float64)
_L = int(_DB4_DEC_LO.size)
_REC_LO = _DB4_DEC_LO[::-1]
_REC_HI = _DB4_DEC_LO * ((-1.0) ** np.arange(_L))
_DEC_HI = _REC_HI[::-1]

# Analysis: pytorch_wavelets applies the time-reversed decomposition filters as
# a strided cross-correlation (F.conv2d == lax.conv: neither flips the kernel).
_H0 = np.ascontiguousarray(_DB4_DEC_LO[::-1], dtype=np.float32)
_H1 = np.ascontiguousarray(_DEC_HI[::-1], dtype=np.float32)
# Synthesis: conv_transpose(x, g, stride=2, padding=L-2) == lhs-dilated (x2)
# cross-correlation with the FLIPPED filter and 1 zero of padding per side.
_G0_FLIP = np.ascontiguousarray(_REC_LO[::-1], dtype=np.float32)
_G1_FLIP = np.ascontiguousarray(_REC_HI[::-1], dtype=np.float32)


# ------------------- DWT / IDWT as fused grouped convolutions ----------------
def _afb1d(x, axis):
    """Analysis filter bank along `axis` (-1 or -2), mode='symmetric'.

    Matches pytorch_wavelets afb1d: symmetric pad of (p//2, (p+1)//2), then a
    stride-2 depthwise cross-correlation with the time-reversed dec filters.
    The lo/hi pair is fused into ONE grouped conv (2 output chans per group).
    """
    c = x.shape[1]
    n = x.shape[axis]
    outsize = (n + _L - 1) // 2
    p = 2 * (outsize - 1) - n + _L
    if axis in (-1, 3):
        pads = [(0, 0), (0, 0), (0, 0), (p // 2, (p + 1) // 2)]
        strides = (1, 2)
        kshape = (1, _L)
    else:
        pads = [(0, 0), (0, 0), (p // 2, (p + 1) // 2), (0, 0)]
        strides = (2, 1)
        kshape = (_L, 1)
    xp = jnp.pad(x, pads, mode="symmetric")
    k = jnp.stack([jnp.asarray(_H0).reshape(kshape),
                   jnp.asarray(_H1).reshape(kshape)], axis=0)          # (2, kh, kw)
    k = jnp.broadcast_to(k[None], (c, 2) + kshape).reshape((2 * c, 1) + kshape)
    dn = lax.conv_dimension_numbers(xp.shape, k.shape, ("NCHW", "OIHW", "NCHW"))
    y = lax.conv_general_dilated(
        xp, k, strides, "VALID", dimension_numbers=dn,
        feature_group_count=c, precision=lax.Precision.HIGHEST)
    y = y.reshape(y.shape[0], c, 2, y.shape[-2], y.shape[-1])
    return y[:, :, 0], y[:, :, 1]                                      # (lo, hi)


def _sfb1d(lo, hi, axis):
    """Synthesis filter bank along `axis`: stride-2 transposed depthwise conv
    with padding L-2 (pytorch_wavelets sfb1d), via lhs-dilated correlation with
    the flipped reconstruction filters.  The lo/hi pair is fused into ONE
    grouped conv (2 input channels -> 1 output channel per group)."""
    n, c = lo.shape[0], lo.shape[1]
    if axis in (-1, 3):
        lhs_dilation = (1, 2)
        padding = [(0, 0), (1, 1)]   # (L-1) - (L-2) zeros per side after dilation
        kshape = (1, _L)
    else:
        lhs_dilation = (2, 1)
        padding = [(1, 1), (0, 0)]
        kshape = (_L, 1)
    x = jnp.stack([lo, hi], axis=2).reshape(n, 2 * c, lo.shape[-2], lo.shape[-1])
    k = jnp.stack([jnp.asarray(_G0_FLIP).reshape(kshape),
                   jnp.asarray(_G1_FLIP).reshape(kshape)], axis=0)     # (2, kh, kw)
    k = jnp.broadcast_to(k[None], (c, 2) + kshape)                     # (c, 2, kh, kw)
    dn = lax.conv_dimension_numbers(x.shape, k.shape, ("NCHW", "OIHW", "NCHW"))
    return lax.conv_general_dilated(
        x, k, (1, 1), padding, lhs_dilation=lhs_dilation,
        dimension_numbers=dn, feature_group_count=c,
        precision=lax.Precision.HIGHEST)


def dwt2d(x, J):
    """DWT(J, mode='symmetric', wave='db4'): (yl, [yh_1..yh_J]) like pytorch_wavelets."""
    yh = []
    ll = x
    for _ in range(J):
        xl, xh = _afb1d(ll, axis=-1)     # along W (dim 3) first
        ll, lh = _afb1d(xl, axis=-2)     # then along H (dim 2)
        hl, hh = _afb1d(xh, axis=-2)
        yh.append(jnp.stack([lh, hl, hh], axis=2))   # bands (loW,hiH),(hiW,loH),(hiW,hiH)
    return ll, yh


def idwt2d(yl, yh):
    """IDWT(mode='symmetric', wave='db4'), matching pytorch_wavelets DWTInverse."""
    ll = yl
    for h in yh[::-1]:
        if ll.shape[-2] > h.shape[-2]:
            ll = ll[..., :-1, :]
        if ll.shape[-1] > h.shape[-1]:
            ll = ll[..., :-1]
        lh, hl, hh = h[:, :, 0], h[:, :, 1], h[:, :, 2]
        lo = _sfb1d(ll, lh, axis=-2)
        hi = _sfb1d(hl, hh, axis=-2)
        ll = _sfb1d(lo, hi, axis=-1)
    return ll


# ------------------- Pallas kernel: fused per-pixel channel mix --------------
def _channel_mix_kernel(xa_ref, xb_ref, wa_ref, wb_ref, oa_ref, ob_ref):
    # x*_ref: (B, Ci, GT, 128)   activations, pixels packed lane-dense
    # w*_ref: (Ci, COT, GT, 128) per-pixel mixing weights for one Co tile
    # o*_ref: (B, COT, GT, 128)
    def mix(x_ref, w_ref, o_ref):
        ci = x_ref.shape[1]
        acc = jnp.zeros(o_ref.shape, jnp.float32)
        if ci <= 32:
            # small static Ci: fully unrolled VPU broadcast-MAC
            for i in range(ci):
                acc = acc + x_ref[:, i:i + 1, :, :] * w_ref[i][None, :, :, :]
        else:
            # production Ci: bounded unroll keeps vreg pressure / compile time sane
            def body(i, a):
                return a + x_ref[:, pl.ds(i, 1), :, :] * w_ref[pl.ds(i, 1)]
            acc = lax.fori_loop(0, ci, body, acc, unroll=8)
        o_ref[...] = acc.astype(o_ref.dtype)

    mix(xa_ref, wa_ref, oa_ref)
    mix(xb_ref, wb_ref, ob_ref)


def _pack_pixels(a, p, lane=128):
    """(..., X, Y) -> (..., G, lane) with G = ceil(p/lane).  Lane-dense packing,
    NO extra sublane-group padding (full-extent blocks waive the (8,128) rule)."""
    g = -(-p // lane)
    lead = a.shape[:-2]
    a = a.reshape(lead + (p,)).astype(jnp.float32)
    a = jnp.pad(a, [(0, 0)] * len(lead) + [(0, g * lane - p)])
    return a.reshape(lead + (g, lane))


def _unpack_pixels(a, p, xx, yy):
    lead = a.shape[:-2]
    flat = a.reshape(lead + (a.shape[-2] * a.shape[-1],))
    return flat[..., :p].reshape(lead + (xx, yy))


def channel_mix_fused(yl, band0, w1, w2, *, vmem_budget_bytes=8 << 20):
    """Fused einsum('bixy,ioxy->boxy') for (yl, w1) and (band0, w2):
    ONE pallas_call, four separate inputs, two outputs (no concat/slice wrappers)."""
    b, ci, xx, yy = yl.shape
    ci_w, co, xw, yw = w1.shape
    assert (ci, xx, yy) == (ci_w, xw, yw)
    assert band0.shape == yl.shape and w2.shape == w1.shape

    lane = 128
    p = xx * yy
    qg = -(-p // lane)                       # natural group count (no pad-to-8)

    xa = _pack_pixels(yl, p, lane)           # (B, Ci, qg, 128)
    xb = _pack_pixels(band0, p, lane)
    wa = _pack_pixels(w1, p, lane)           # (Ci, Co, qg, 128)
    wb = _pack_pixels(w2, p, lane)

    # Single grid step whenever the double-buffered blocks fit the VMEM budget
    # (they do at these sizes); otherwise shrink only the Co tile.  The q axis
    # stays full-extent so stores remain lane-dense and the sublane rule is waived.
    gt = qg

    def _blocks_bytes(cot):
        per = 4  # f32
        xbytes = b * ci * gt * lane * per
        wbytes = ci * cot * gt * lane * per
        obytes = b * cot * gt * lane * per
        return 2 * 2 * (xbytes + wbytes + obytes)   # two problems, double-buffered

    cot = co
    while cot > 1 and _blocks_bytes(cot) > vmem_budget_bytes:
        cot -= 1
        while cot > 1 and co % cot:
            cot -= 1
    # TODO(synk): at production Ci/Co, pad Co to a sublane-friendly multiple and
    #             add a Ci accumulator grid axis (pattern P3) instead of letting
    #             the Co tile shrink toward 1.

    grid = (qg // gt, co // cot)             # (1, 1) at these sizes -> one step
    out_shape = (jax.ShapeDtypeStruct((b, co, qg, lane), jnp.float32),
                 jax.ShapeDtypeStruct((b, co, qg, lane), jnp.float32))

    oa, ob = pl.pallas_call(
        _channel_mix_kernel,
        out_shape=out_shape,
        grid_spec=pltpu.PrefetchScalarGridSpec(
            num_scalar_prefetch=0,
            grid=grid,                        # Co innermost: activation blocks stay resident
            in_specs=[
                pl.BlockSpec((b, ci, gt, lane), lambda q, c: (0, 0, q, 0)),
                pl.BlockSpec((b, ci, gt, lane), lambda q, c: (0, 0, q, 0)),
                pl.BlockSpec((ci, cot, gt, lane), lambda q, c: (0, c, q, 0)),
                pl.BlockSpec((ci, cot, gt, lane), lambda q, c: (0, c, q, 0)),
            ],
            out_specs=[
                pl.BlockSpec((b, cot, gt, lane), lambda q, c: (0, c, q, 0)),
                pl.BlockSpec((b, cot, gt, lane), lambda q, c: (0, c, q, 0)),
            ],
        ),
        compiler_params=pltpu.CompilerParams(
            dimension_semantics=("parallel", "parallel")),
    )(xa, xb, wa, wb)

    return _unpack_pixels(oa, p, xx, yy), _unpack_pixels(ob, p, xx, yy)


# ----------------------------- WaveConv2d forward ----------------------------
def wave_conv2d_forward(x, weights1, weights2, J=5):
    """Matches WaveConv2d.forward: DWT -> mix yl (w1) and yh[-1][:,:,0] (w2) -> IDWT."""
    yl, yh = dwt2d(x, J)
    band0 = yh[-1][:, :, 0]
    out_ft, band0_mixed = channel_mix_fused(yl, band0, weights1, weights2)
    yh = list(yh)
    yh[-1] = jnp.concatenate([band0_mixed[:, :, None], yh[-1][:, :, 1:]], axis=2)
    return idwt2d(out_ft, yh)


# ----------------------------------- main ------------------------------------
if __name__ == "__main__":
    key = jax.random.PRNGKey(0)
    B, C_in, C_out, H, W, J = 2, 4, 4, 32, 32, 5
    kx, k1, k2 = jax.random.split(key, 3)
    x = jax.random.normal(kx, (B, C_in, H, W), dtype=jnp.float32)

    def dwt_len(n, levels):
        for _ in range(levels):
            n = (n + _L - 1) // 2
        return n

    # Weights' spatial dims must equal the J-level DWT approximation dims.
    modes1 = dwt_len(H, J)   # 7 for H=32, J=5
    modes2 = dwt_len(W, J)   # 7 for W=32, J=5

    scale = 1.0 / (C_in * C_out)
    weights1 = scale * jax.random.uniform(k1, (C_in, C_out, modes1, modes2), dtype=jnp.float32)
    weights2 = scale * jax.random.uniform(k2, (C_in, C_out, modes1, modes2), dtype=jnp.float32)

    # Sanity: fused Pallas channel mix vs. reference einsums on the actual DWT output.
    yl_ref, yh_ref = dwt2d(x, J)
    band0_ref = yh_ref[-1][:, :, 0]
    got_yl, got_b0 = channel_mix_fused(yl_ref, band0_ref, weights1, weights2)
    ref_yl = jnp.einsum("bixy,ioxy->boxy", yl_ref, weights1,
                        precision=lax.Precision.HIGHEST)
    ref_b0 = jnp.einsum("bixy,ioxy->boxy", band0_ref, weights2,
                        precision=lax.Precision.HIGHEST)
    np.testing.assert_allclose(np.asarray(got_yl), np.asarray(ref_yl), rtol=1e-5, atol=1e-6)
    np.testing.assert_allclose(np.asarray(got_b0), np.asarray(ref_b0), rtol=1e-5, atol=1e-6)

    fwd = jax.jit(lambda a, w1, w2: wave_conv2d_forward(a, w1, w2, J=J))
    y = jax.block_until_ready(fwd(x, weights1, weights2))

    assert y.shape == (B, C_out, H, W), y.shape
    assert bool(jnp.all(jnp.isfinite(y)))
    print("KERNEL_OK")
</pallas_src>

<mosaic_0001>
module attributes {stable_mosaic.version = 11 : i64} {
  func.func @_channel_mix_kernel(%arg0: i32, %arg1: i32, %arg2: memref<2x4x1x128xf32, #tpu.memory_space<vmem>>, %arg3: memref<2x4x1x128xf32, #tpu.memory_space<vmem>>, %arg4: memref<4x4x1x128xf32, #tpu.memory_space<vmem>>, %arg5: memref<4x4x1x128xf32, #tpu.memory_space<vmem>>, %arg6: memref<2x4x1x128xf32, #tpu.memory_space<vmem>>, %arg7: memref<2x4x1x128xf32, #tpu.memory_space<vmem>>) attributes {dimension_semantics = [#tpu.dimension_semantics<parallel>, #tpu.dimension_semantics<parallel>], iteration_bounds = array<i64: 1, 1>, scalar_prefetch = 0 : i64, scratch_operands = 0 : i64, tpu.core_type = #tpu.core_type<tc>, window_params = [{transform_indices = @transform_0, window_bounds = array<i64: 2, 4, 1, 128>}, {transform_indices = @transform_1, window_bounds = array<i64: 2, 4, 1, 128>}, {transform_indices = @transform_2, window_bounds = array<i64: 4, 4, 1, 128>}, {transform_indices = @transform_3, window_bounds = array<i64: 4, 4, 1, 128>}, {transform_indices = @transform_4, window_bounds = array<i64: 2, 4, 1, 128>}, {transform_indices = @transform_5, window_bounds = array<i64: 2, 4, 1, 128>}]} {
    %cst = arith.constant 0.000000e+00 : f32
    %0 = vector.broadcast %cst : f32 to vector<2x4x1x128xf32>
    %c0 = arith.constant 0 : index
    %c0_0 = arith.constant 0 : index
    %c0_1 = arith.constant 0 : index
    %c0_2 = arith.constant 0 : index
    %1 = vector.load %arg2[%c0, %c0_0, %c0_1, %c0_2] : memref<2x4x1x128xf32, #tpu.memory_space<vmem>>, vector<2x1x1x128xf32>
    %c0_3 = arith.constant 0 : index
    %c0_4 = arith.constant 0 : index
    %c0_5 = arith.constant 0 : index
    %c0_6 = arith.constant 0 : index
    %2 = vector.load %arg4[%c0_3, %c0_4, %c0_5, %c0_6] : memref<4x4x1x128xf32, #tpu.memory_space<vmem>>, vector<1x4x1x128xf32>
    %3 = vector.shape_cast %2 : vector<1x4x1x128xf32> to vector<4x1x128xf32>
    %4 = vector.shape_cast %3 : vector<4x1x128xf32> to vector<1x4x1x128xf32>
    %5 = vector.broadcast %1 : vector<2x1x1x128xf32> to vector<2x4x1x128xf32>
    %6 = vector.broadcast %4 : vector<1x4x1x128xf32> to vector<2x4x1x128xf32>
    %7 = arith.mulf %5, %6 : vector<2x4x1x128xf32>
    %8 = arith.addf %0, %7 : vector<2x4x1x128xf32>
    %c0_7 = arith.constant 0 : index
    %c1 = arith.constant 1 : index
    %c0_8 = arith.constant 0 : index
    %c0_9 = arith.constant 0 : index
    %9 = vector.load %arg2[%c0_7, %c1, %c0_8, %c0_9] : memref<2x4x1x128xf32, #tpu.memory_space<vmem>>, vector<2x1x1x128xf32>
    %c1_10 = arith.constant 1 : index
    %c0_11 = arith.constant 0 : index
    %c0_12 = arith.constant 0 : index
    %c0_13 = arith.constant 0 : index
    %10 = vector.load %arg4[%c1_10, %c0_11, %c0_12, %c0_13] : memref<4x4x1x128xf32, #tpu.memory_space<vmem>>, vector<1x4x1x128xf32>
    %11 = vector.shape_cast %10 : vector<1x4x1x128xf32> to vector<4x1x128xf32>
    %12 = vector.shape_cast %11 : vector<4x1x128xf32> to vector<1x4x1x128xf32>
    %13 = vector.broadcast %9 : vector<2x1x1x128xf32> to vector<2x4x1x128xf32>
    %14 = vector.broadcast %12 : vector<1x4x1x128xf32> to vector<2x4x1x128xf32>
    %15 = arith.mulf %13, %14 : vector<2x4x1x128xf32>
    %16 = arith.addf %8, %15 : vector<2x4x1x128xf32>
    %c0_14 = arith.constant 0 : index
    %c2 = arith.constant 2 : index
    %c0_15 = arith.constant 0 : index
    %c0_16 = arith.constant 0 : index
    %17 = vector.load %arg2[%c0_14, %c2, %c0_15, %c0_16] : memref<2x4x1x128xf32, #tpu.memory_space<vmem>>, vector<2x1x1x128xf32>
    %c2_17 = arith.constant 2 : index
    %c0_18 = arith.constant 0 : index
    %c0_19 = arith.constant 0 : index
    %c0_20 = arith.constant 0 : index
    %18 = vector.load %arg4[%c2_17, %c0_18, %c0_19, %c0_20] : memref<4x4x1x128xf32, #tpu.memory_space<vmem>>, vector<1x4x1x128xf32>
    %19 = vector.shape_cast %18 : vector<1x4x1x128xf32> to vector<4x1x128xf32>
    %20 = vector.shape_cast %19 : vector<4x1x128xf32> to vector<1x4x1x128xf32>
    %21 = vector.broadcast %17 : vector<2x1x1x128xf32> to vector<2x4x1x128xf32>
    %22 = vector.broadcast %20 : vector<1x4x1x128xf32> to vector<2x4x1x128xf32>
    %23 = arith.mulf %21, %22 : vector<2x4x1x128xf32>
    %24 = arith.addf %16, %23 : vector<2x4x1x128xf32>
    %c0_21 = arith.constant 0 : index
    %c3 = arith.constant 3 : index
    %c0_22 = arith.constant 0 : index
    %c0_23 = arith.constant 0 : index
    %25 = vector.load %arg2[%c0_21, %c3, %c0_22, %c0_23] : memref<2x4x1x128xf32, #tpu.memory_space<vmem>>, vector<2x1x1x128xf32>
    %c3_24 = arith.constant 3 : index
    %c0_25 = arith.constant 0 : index
    %c0_26 = arith.constant 0 : index
    %c0_27 = arith.constant 0 : index
    %26 = vector.load %arg4[%c3_24, %c0_25, %c0_26, %c0_27] : memref<4x4x1x128xf32, #tpu.memory_space<vmem>>, vector<1x4x1x128xf32>
    %27 = vector.shape_cast %26 : vector<1x4x1x128xf32> to vector<4x1x128xf32>
    %28 = vector.shape_cast %27 : vector<4x1x128xf32> to vector<1x4x1x128xf32>
    %29 = vector.broadcast %25 : vector<2x1x1x128xf32> to vector<2x4x1x128xf32>
    %30 = vector.broadcast %28 : vector<1x4x1x128xf32> to vector<2x4x1x128xf32>
    %31 = arith.mulf %29, %30 : vector<2x4x1x128xf32>
    %32 = arith.addf %24, %31 : vector<2x4x1x128xf32>
    %c0_28 = arith.constant 0 : index
    %c0_29 = arith.constant 0 : index
    %c0_30 = arith.constant 0 : index
    %c0_31 = arith.constant 0 : index
    %33 = vector.load %arg6[%c0_28, %c0_29, %c0_30, %c0_31] : memref<2x4x1x128xf32, #tpu.memory_space<vmem>>, vector<2x4x1x128xf32>
    tpu.vector_store %arg6[%c0_28, %c0_29, %c0_30, %c0_31], %32 {strides = array<i32>} : memref<2x4x1x128xf32, #tpu.memory_space<vmem>>, vector<2x4x1x128xf32>,
    %cst_32 = arith.constant 0.000000e+00 : f32
    %34 = vector.broadcast %cst_32 : f32 to vector<2x4x1x128xf32>
    %c0_33 = arith.constant 0 : index
    %c0_34 = arith.constant 0 : index
    %c0_35 = arith.constant 0 : index
    %c0_36 = arith.constant 0 : index
    %35 = vector.load %arg3[%c0_33, %c0_34, %c0_35, %c0_36] : memref<2x4x1x128xf32, #tpu.memory_space<vmem>>, vector<2x1x1x128xf32>
    %c0_37 = arith.constant 0 : index
    %c0_38 = arith.constant 0 : index
    %c0_39 = arith.constant 0 : index
    %c0_40 = arith.constant 0 : index
    %36 = vector.load %arg5[%c0_37, %c0_38, %c0_39, %c0_40] : memref<4x4x1x128xf32, #tpu.memory_space<vmem>>, vector<1x4x1x128xf32>
    %37 = vector.shape_cast %36 : vector<1x4x1x128xf32> to vector<4x1x128xf32>
    %38 = vector.shape_cast %37 : vector<4x1x128xf32> to vector<1x4x1x128xf32>
    %39 = vector.broadcast %35 : vector<2x1x1x128xf32> to vector<2x4x1x128xf32>
    %40 = vector.broadcast %38 : vector<1x4x1x128xf32> to vector<2x4x1x128xf32>
    %41 = arith.mulf %39, %40 : vector<2x4x1x128xf32>
    %42 = arith.addf %34, %41 : vector<2x4x1x128xf32>
    %c0_41 = arith.constant 0 : index
    %c1_42 = arith.constant 1 : index
    %c0_43 = arith.constant 0 : index
    %c0_44 = arith.constant 0 : index
    %43 = vector.load %arg3[%c0_41, %c1_42, %c0_43, %c0_44] : memref<2x4x1x128xf32, #tpu.memory_space<vmem>>, vector<2x1x1x128xf32>
    %c1_45 = arith.constant 1 : index
    %c0_46 = arith.constant 0 : index
    %c0_47 = arith.constant 0 : index
    %c0_48 = arith.constant 0 : index
    %44 = vector.load %arg5[%c1_45, %c0_46, %c0_47, %c0_48] : memref<4x4x1x128xf32, #tpu.memory_space<vmem>>, vector<1x4x1x128xf32>
    %45 = vector.shape_cast %44 : vector<1x4x1x128xf32> to vector<4x1x128xf32>
    %46 = vector.shape_cast %45 : vector<4x1x128xf32> to vector<1x4x1x128xf32>
    %47 = vector.broadcast %43 : vector<2x1x1x128xf32> to vector<2x4x1x128xf32>
    %48 = vector.broadcast %46 : vector<1x4x1x128xf32> to vector<2x4x1x128xf32>
    %49 = arith.mulf %47, %48 : vector<2x4x1x128xf32>
    %50 = arith.addf %42, %49 : vector<2x4x1x128xf32>
    %c0_49 = arith.constant 0 : index
    %c2_50 = arith.constant 2 : index
    %c0_51 = arith.constant 0 : index
    %c0_52 = arith.constant 0 : index
    %51 = vector.load %arg3[%c0_49, %c2_50, %c0_51, %c0_52] : memref<2x4x1x128xf32, #tpu.memory_space<vmem>>, vector<2x1x1x128xf32>
    %c2_53 = arith.constant 2 : index
    %c0_54 = arith.constant 0 : index
    %c0_55 = arith.constant 0 : index
    %c0_56 = arith.constant 0 : index
    %52 = vector.load %arg5[%c2_53, %c0_54, %c0_55, %c0_56] : memref<4x4x1x128xf32, #tpu.memory_space<vmem>>, vector<1x4x1x128xf32>
    %53 = vector.shape_cast %52 : vector<1x4x1x128xf32> to vector<4x1x128xf32>
    %54 = vector.shape_cast %53 : vector<4x1x128xf32> to vector<1x4x1x128xf32>
    %55 = vector.broadcast %51 : vector<2x1x1x128xf32> to vector<2x4x1x128xf32>
    %56 = vector.broadcast %54 : vector<1x4x1x128xf32> to vector<2x4x1x128xf32>
    %57 = arith.mulf %55, %56 : vector<2x4x1x128xf32>
    %58 = arith.addf %50, %57 : vector<2x4x1x128xf32>
    %c0_57 = arith.constant 0 : index
    %c3_58 = arith.constant 3 : index
    %c0_59 = arith.constant 0 : index
    %c0_60 = arith.constant 0 : index
    %59 = vector.load %arg3[%c0_57, %c3_58, %c0_59, %c0_60] : memref<2x4x1x128xf32, #tpu.memory_space<vmem>>, vector<2x1x1x128xf32>
    %c3_61 = arith.constant 3 : index
    %c0_62 = arith.constant 0 : index
    %c0_63 = arith.constant 0 : index
    %c0_64 = arith.constant 0 : index
    %60 = vector.load %arg5[%c3_61, %c0_62, %c0_63, %c0_64] : memref<4x4x1x128xf32, #tpu.memory_space<vmem>>, vector<1x4x1x128xf32>
    %61 = vector.shape_cast %60 : vector<1x4x1x128xf32> to vector<4x1x128xf32>
    %62 = vector.shape_cast %61 : vector<4x1x128xf32> to vector<1x4x1x128xf32>
    %63 = vector.broadcast %59 : vector<2x1x1x128xf32> to vector<2x4x1x128xf32>
    %64 = vector.broadcast %62 : vector<1x4x1x128xf32> to vector<2x4x1x128xf32>
    %65 = arith.mulf %63, %64 : vector<2x4x1x128xf32>
    %66 = arith.addf %58, %65 : vector<2x4x1x128xf32>
    %c0_65 = arith.constant 0 : index
    %c0_66 = arith.constant 0 : index
    %c0_67 = arith.constant 0 : index
    %c0_68 = arith.constant 0 : index
    %67 = vector.load %arg7[%c0_65, %c0_66, %c0_67, %c0_68] : memref<2x4x1x128xf32, #tpu.memory_space<vmem>>, vector<2x4x1x128xf32>
    tpu.vector_store %arg7[%c0_65, %c0_66, %c0_67, %c0_68], %66 {strides = array<i32>} : memref<2x4x1x128xf32, #tpu.memory_space<vmem>>, vector<2x4x1x128xf32>,
    return
  }
  func.func @transform_0(%arg0: i32, %arg1: i32) -> (i32, i32, i32, i32) {
    %c0_i32 = arith.constant 0 : i32
    %c0_i32_0 = arith.constant 0 : i32
    %c0_i32_1 = arith.constant 0 : i32
    %c0_i32_2 = arith.constant 0 : i32
    return %c0_i32, %c0_i32_0, %arg0, %c0_i32_1 : i32, i32, i32, i32
  }
  func.func @transform_1(%arg0: i32, %arg1: i32) -> (i32, i32, i32, i32) {
    %c0_i32 = arith.constant 0 : i32
    %c0_i32_0 = arith.constant 0 : i32
    %c0_i32_1 = arith.constant 0 : i32
    %c0_i32_2 = arith.constant 0 : i32
    return %c0_i32, %c0_i32_0, %arg0, %c0_i32_1 : i32, i32, i32, i32
  }
  func.func @transform_2(%arg0: i32, %arg1: i32) -> (i32, i32, i32, i32) {
    %c0_i32 = arith.constant 0 : i32
    %c0_i32_0 = arith.constant 0 : i32
    %c0_i32_1 = arith.constant 0 : i32
    return %c0_i32, %arg1, %arg0, %c0_i32_0 : i32, i32, i32, i32
  }
  func.func @transform_3(%arg0: i32, %arg1: i32) -> (i32, i32, i32, i32) {
    %c0_i32 = arith.constant 0 : i32
    %c0_i32_0 = arith.constant 0 : i32
    %c0_i32_1 = arith.constant 0 : i32
    return %c0_i32, %arg1, %arg0, %c0_i32_0 : i32, i32, i32, i32
  }
  func.func @transform_4(%arg0: i32, %arg1: i32) -> (i32, i32, i32, i32) {
    %c0_i32 = arith.constant 0 : i32
    %c0_i32_0 = arith.constant 0 : i32
    %c0_i32_1 = arith.constant 0 : i32
    return %c0_i32, %arg1, %arg0, %c0_i32_0 : i32, i32, i32, i32
  }
  func.func @transform_5(%arg0: i32, %arg1: i32) -> (i32, i32, i32, i32) {
    %c0_i32 = arith.constant 0 : i32
    %c0_i32_0 = arith.constant 0 : i32
    %c0_i32_1 = arith.constant 0 : i32
    return %c0_i32, %arg1, %arg0, %c0_i32_0 : i32, i32, i32, i32
  }
}

</mosaic_0001>

<bundles_post_ra>
// kernel: tpu_custom_call.1
= control target key start
LH: loop header
LB: loop body
LE: loop exit
PB: predicated region body
PF: predicated region fallthrough
CT: control target
= control target key end

     0   :  { %11 = vsyncpa [#allocation3], 0  ;;  %s690_s0 = inlined_call_operand.hbm [shape: f32[2,4,1,128], index: 0, kind: input, shape index: {}]   ;;  %s691_s1 = inlined_call_operand.hbm [shape: f32[2,4,1,128], index: 1, kind: input, shape index: {}]   ;;  %s692_s2 = inlined_call_operand.hbm [shape: f32[4,4,1,128], index: 2, kind: input, shape index: {}]   ;;  %s693_s3 = inlined_call_operand.hbm [shape: f32[4,4,1,128], index: 3, kind: input, shape index: {}]   ;;  %s694_s4 = inlined_call_operand.hbm [shape: f32[2,4,1,128], index: 4, kind: output, shape index: {0}]   ;;  %s695_s5 = inlined_call_operand.hbm [shape: f32[2,4,1,128], index: 5, kind: output, shape index: {1}]  }
   0x1   :  { %12 = vsyncpa [#allocation6], 0 }
   0x2   :  { %13 = vsyncpa [#allocation9], 0 }
   0x3   :  { %14 = vsyncpa [#allocation4], 0 }
   0x4   :  { %15 = vsyncpa [#allocation12], 0  ;;  %s465_s18 = smov [#allocation5]   ;;  %s466_s20 = smov [#allocation2]  }
   0x5   :  { %s33_s19 = sshll.u32 %s465_s18, 4  ;;  %s21_s21 = sshll.u32 %s466_s20, 4  ;;  %s34_s19 = int_to_ptr.vmem [resolvable:$true] %s33_s19  ;;  %s503_s21 = int_to_ptr.vmem [resolvable:$true] %s21_s21 }
   0x6   :  { %s323_s24 = scalar_lea.hbm %s691_s1, 128 }
   0x7   :  { %p324_p0 = scmp.ne.s32.totalorder %s691_s1, %s323_s24  ;;  %p327_p1 = scmp.lt.u32.totalorder %s323_s24, %s691_s1 }
   0x9   :  { %p329_p2 = pnand %p327_p1, %p324_p0 }
   0xb   :  { %332 = shalt.err (!%p329_p2)
}
   0xc   :  { %s333_s29 = scalar_lea.vmem %s34_s19, 128  ;;  %p338_p4 = scmp.lt.s32.totalorder %s34_s19, %s34_s19 }
   0xd   :  { %p334_p3 = scmp.ne.s32.totalorder %s34_s19, %s333_s29  ;;  %p339_p5 = scmp.lt.s32.totalorder %s333_s29, %s333_s29 }
   0xf   :  { %p340_p6 = por %p339_p5, %p338_p4 }
  0x11   :  { %p341_p7 = pnand %p340_p6, %p334_p3 }
  0x13   :  { %344 = shalt.err (!%p341_p7)
}
  0x14   :  { %s467_s30 = smov 16   ;;  %s468_s6 = smov 1  }
  0x15   :  { %39 = dma.hbm_to_vmem [thread:$0]  %s691_s1, 128, %s34_s19, [#allocation6], %s467_s30, %s467_s30, %s468_s6  }
  0x16   :  { %s345_s11 = scalar_lea.hbm %s690_s0, 128 }
  0x17   :  { %p346_p8 = scmp.ne.s32.totalorder %s690_s0, %s345_s11  ;;  %p349_p9 = scmp.lt.u32.totalorder %s345_s11, %s690_s0 }
  0x19   :  { %p351_p10 = pnand %p349_p9, %p346_p8 }
  0x1b   :  { %354 = shalt.err (!%p351_p10)
}
  0x1c   :  { %s355_s16 = scalar_lea.vmem %s503_s21, 128  ;;  %p360_p12 = scmp.lt.s32.totalorder %s503_s21, %s503_s21 }
  0x1d   :  { %p356_p11 = scmp.ne.s32.totalorder %s503_s21, %s355_s16  ;;  %p361_p13 = scmp.lt.s32.totalorder %s355_s16, %s355_s16 }
  0x1f   :  { %p362_p0 = por %p361_p13, %p360_p12 }
  0x21   :  { %p363_p1 = pnand %p362_p0, %p356_p11 }
  0x23   :  { %366 = shalt.err (!%p363_p1)
}
  0x24   :  { %27 = dma.hbm_to_vmem [thread:$0]  %s690_s0, 128, %s503_s21, [#allocation3], %s467_s30, %s467_s30, %s468_s6  }
  0x25   :  { %s469_s18 = smov [#allocation7]   ;;  %s470_s20 = smov [#allocation8]  }
  0x26   :  { %s45_s19 = sshll.u32 %s469_s18, 4  ;;  %s57_s22 = sshll.u32 %s470_s20, 4  ;;  %s46_s19 = int_to_ptr.vmem [resolvable:$true] %s45_s19  ;;  %s540_s22 = int_to_ptr.vmem [resolvable:$true] %s57_s22 }
  0x27   :  { %s367_s25 = scalar_lea.hbm %s692_s2, 256 }
  0x28   :  { %p368_p2 = scmp.ne.s32.totalorder %s692_s2, %s367_s25  ;;  %p371_p3 = scmp.lt.u32.totalorder %s367_s25, %s692_s2 }
  0x2a   :  { %p373_p4 = pnand %p371_p3, %p368_p2 }
  0x2c   :  { %376 = shalt.err (!%p373_p4)
}
  0x2d   :  { %s377_s0 = scalar_lea.vmem %s46_s19, 256  ;;  %p382_p6 = scmp.lt.s32.totalorder %s46_s19, %s46_s19 }
  0x2e   :  { %p378_p5 = scmp.ne.s32.totalorder %s46_s19, %s377_s0  ;;  %p383_p7 = scmp.lt.s32.totalorder %s377_s0, %s377_s0 }
  0x30   :  { %p384_p8 = por %p383_p7, %p382_p6 }
  0x32   :  { %p385_p9 = pnand %p384_p8, %p378_p5 }
  0x34   :  { %388 = shalt.err (!%p385_p9)
}
  0x35   :  { %51 = dma.hbm_to_vmem [thread:$0]  %s692_s2, 256, %s46_s19, [#allocation6], %s467_s30, %s467_s30, %s468_s6  }
  0x36   :  { %s389_s10 = scalar_lea.hbm %s693_s3, 256 }
  0x37   :  { %p390_p10 = scmp.ne.s32.totalorder %s693_s3, %s389_s10  ;;  %p393_p11 = scmp.lt.u32.totalorder %s389_s10, %s693_s3 }
  0x39   :  { %p395_p12 = pnand %p393_p11, %p390_p10 }
  0x3b   :  { %398 = shalt.err (!%p395_p12)
}
  0x3c   :  { %s399_s15 = scalar_lea.vmem %s540_s22, 256  ;;  %p404_p0 = scmp.lt.s32.totalorder %s540_s22, %s540_s22 }
  0x3d   :  { %p400_p13 = scmp.ne.s32.totalorder %s540_s22, %s399_s15  ;;  %p405_p1 = scmp.lt.s32.totalorder %s399_s15, %s399_s15 }
  0x3f   :  { %p406_p2 = por %p405_p1, %p404_p0 }
  0x41   :  { %p407_p3 = pnand %p406_p2, %p400_p13 }
  0x43   :  { %410 = shalt.err (!%p407_p3)
}
  0x44   :  { %63 = dma.hbm_to_vmem [thread:$0]  %s693_s3, 256, %s540_s22, [#allocation9], %s467_s30, %s467_s30, %s468_s6  }
  0x45   :  { %455 = dma.done.wait [#allocation3], 128  }
  0x46   :  { %456 = vsyncadd [#allocation3], 4294967168 }
  0x47   :  { %457 = dma.done.wait [#allocation6], 384  }
  0x48   :  { %458 = vsyncadd [#allocation6], 4294966912 }
  0x49   :  { %459 = dma.done.wait [#allocation9], 256  }
  0x4a   :  { %460 = vsyncadd [#allocation9], 4294967040  ;;  %v76_v0 = vld [vmem:[#allocation2] sm:$0x1]  ;;  %v78_v1 = vld [vmem:[#allocation7] sm:$0x1] }
  0x4b   :  { %v99_v2 = vld [vmem:[#allocation2 + $0x1] sm:$0x1]  ;;  %v82_v3 = vmul.f32 %v78_v1, %v76_v0  ;;  %v102_v4 = vld [vmem:[#allocation7 + $0x4] sm:$0x1]  ;;  %v123_v5 = vld [vmem:[#allocation2 + $0x2] sm:$0x1] }
  0x4c   :  { %v126_v6 = vld [vmem:[#allocation7 + $0x8] sm:$0x1]  ;;  %v106_v7 = vmul.f32 %v102_v4, %v99_v2  ;;  %v147_v9 = vld [vmem:[#allocation2 + $0x3] sm:$0x1]  ;;  %v150_v10 = vld [vmem:[#allocation7 + $0xc] sm:$0x1] }
  0x4d   :  { %v130_v8 = vmul.f32 %v126_v6, %v123_v5  ;;  %v79_v11 = vld [vmem:[#allocation7 + $0x1] sm:$0x1]  ;;  %v103_v13 = vld [vmem:[#allocation7 + $0x5] sm:$0x1]  ;;  %v127_v14 = vld [vmem:[#allocation7 + $0x9] sm:$0x1]  ;;  %v154_v17 = vmul.f32 %v150_v10, %v147_v9 }
  0x4e   :  { %v83_v12 = vmul.f32 %v79_v11, %v76_v0  ;;  %v151_v15 = vld [vmem:[#allocation7 + $0xd] sm:$0x1]  ;;  %v114_v16 = vadd.f32 %v106_v7, %v82_v3  ;;  %v107_v18 = vmul.f32 %v103_v13, %v99_v2  ;;  %v131_v19 = vmul.f32 %v127_v14, %v123_v5  ;;  %v80_v20 = vld [vmem:[#allocation7 + $0x2] sm:$0x1]  ;;  %v104_v21 = vld [vmem:[#allocation7 + $0x6] sm:$0x1] }
  0x4f   :  { %v128_v22 = vld [vmem:[#allocation7 + $0xa] sm:$0x1]  ;;  %v155_v23 = vmul.f32 %v151_v15, %v147_v9  ;;  %v84_v24 = vmul.f32 %v80_v20, %v76_v0  ;;  %v108_v25 = vmul.f32 %v104_v21, %v99_v2  ;;  %v152_v27 = vld [vmem:[#allocation7 + $0xe] sm:$0x1]  ;;  %v81_v28 = vld [vmem:[#allocation7 + $0x3] sm:$0x1] }
  0x50   :  { %v132_v26 = vmul.f32 %v128_v22, %v123_v5  ;;  %v105_v29 = vld [vmem:[#allocation7 + $0x7] sm:$0x1]  ;;  %v138_v30 = vadd.f32 %v130_v8, %v114_v16  ;;  %v115_v31 = vadd.f32 %v107_v18, %v83_v12  ;;  %v156_v32 = vmul.f32 %v152_v27, %v147_v9  ;;  %v129_v34 = vld [vmem:[#allocation7 + $0xb] sm:$0x1]  ;;  %v153_v35 = vld [vmem:[#allocation7 + $0xf] sm:$0x1] }
  0x51   :  { %v85_v33 = vmul.f32 %v81_v28, %v76_v0  ;;  %v77_v36 = vld [vmem:[#allocation2 + $0x4] sm:$0x1]  ;;  %v116_v37 = vadd.f32 %v108_v25, %v84_v24  ;;  %v109_v38 = vmul.f32 %v105_v29, %v99_v2  ;;  %v133_v39 = vmul.f32 %v129_v34, %v123_v5  ;;  %v100_v41 = vld [vmem:[#allocation2 + $0x5] sm:$0x1]  ;;  %v124_v42 = vld [vmem:[#allocation2 + $0x6] sm:$0x1] }
  0x52   :  { %v157_v40 = vmul.f32 %v153_v35, %v147_v9  ;;  %v148_v43 = vld [vmem:[#allocation2 + $0x7] sm:$0x1]  ;;  %v162_v44 = vadd.f32 %v154_v17, %v138_v30  ;;  %v139_v45 = vadd.f32 %v131_v19, %v115_v31  ;;  %v86_v46 = vmul.f32 %v78_v1, %v77_v36  ;;  %v577_v60 = vld [vmem:[#allocation5] sm:$0x1]  ;;  %v579_v1 = vld [vmem:[#allocation8] sm:$0x1] }
  0x53   :  { %v110_v47 = vmul.f32 %v102_v4, %v100_v41  ;;  %v140_v48 = vadd.f32 %v132_v26, %v116_v37  ;;  %v117_v49 = vadd.f32 %v109_v38, %v85_v33  ;;  %v134_v50 = vmul.f32 %v126_v6, %v124_v42  ;;  %v581_v2 = vld [vmem:[#allocation5 + $0x1] sm:$0x1]  ;;  %v583_v3 = vld [vmem:[#allocation8 + $0x4] sm:$0x1]  ;;  %v225_v8 = vld [vmem:[#allocation5 + $0x2] sm:$0x1] }
  0x54   :  { %v158_v51 = vmul.f32 %v150_v10, %v148_v43  ;;  %170 = vst [vmem:[#allocation10] sm:$0x1] %v162_v44  ;;  %v163_v52 = vadd.f32 %v155_v23, %v139_v45  ;;  %v87_v54 = vmul.f32 %v79_v11, %v77_v36  ;;  %v111_v55 = vmul.f32 %v103_v13, %v100_v41  ;;  %v585_v9 = vld [vmem:[#allocation8 + $0x8] sm:$0x1]  ;;  %v249_v10 = vld [vmem:[#allocation5 + $0x3] sm:$0x1] }
  0x55   :  { %v118_v53 = vadd.f32 %v110_v47, %v86_v46  ;;  %v164_v56 = vadd.f32 %v156_v32, %v140_v48  ;;  %v141_v57 = vadd.f32 %v133_v39, %v117_v49  ;;  %v135_v58 = vmul.f32 %v127_v14, %v124_v42  ;;  %v589_v16 = vld [vmem:[#allocation8 + $0x1] sm:$0x1]  ;;  %v591_v17 = vld [vmem:[#allocation8 + $0x5] sm:$0x1]  ;;  %v599_v23 = vld [vmem:[#allocation8 + $0xd] sm:$0x1] }
  0x56   :  { %v159_v59 = vmul.f32 %v151_v15, %v148_v43  ;;  %171 = vst [vmem:[#allocation10 + $0x1] sm:$0x1] %v163_v52  ;;  %v119_v62 = vadd.f32 %v111_v55, %v87_v54  ;;  %v88_v63 = vmul.f32 %v80_v20, %v77_v36  ;;  %v112_v0 = vmul.f32 %v104_v21, %v100_v41  ;;  %v587_v15 = vld [vmem:[#allocation8 + $0xc] sm:$0x1]  ;;  %s471_s3 = smov [#allocation10]  }
  0x57   :  { %v142_v61 = vadd.f32 %v134_v50, %v118_v53  ;;  %172 = vst [vmem:[#allocation10 + $0x2] sm:$0x1] %v164_v56  ;;  %v165_v4 = vadd.f32 %v157_v40, %v141_v57  ;;  %v136_v5 = vmul.f32 %v128_v22, %v124_v42  ;;  %v160_v6 = vmul.f32 %v152_v27, %v148_v43  ;;  %v597_v22 = vld [vmem:[#allocation8 + $0x9] sm:$0x1]  ;;  %s285_s1 = sshll.u32 %s471_s3, 4  ;;  %s633_s1 = int_to_ptr.vmem [resolvable:$true] %s285_s1 }
  0x58   :  { %v89_v7 = vmul.f32 %v81_v28, %v77_v36  ;;  %v143_v12 = vadd.f32 %v135_v58, %v119_v62  ;;  %v120_v13 = vadd.f32 %v112_v0, %v88_v63  ;;  %v113_v14 = vmul.f32 %v105_v29, %v100_v41  ;;  %v602_v28 = vld [vmem:[#allocation8 + $0x2] sm:$0x1]  ;;  %v604_v29 = vld [vmem:[#allocation8 + $0x6] sm:$0x1]  ;;  %v615_v36 = vld [vmem:[#allocation8 + $0x3] sm:$0x1]  ;;  %p416_p5 = scmp.lt.s32.totalorder %s633_s1, %s633_s1 }
  0x59   :  { %v166_v11 = vadd.f32 %v158_v51, %v142_v61  ;;  %173 = vst [vmem:[#allocation10 + $0x3] sm:$0x1] %v165_v4  ;;  %v137_v18 = vmul.f32 %v129_v34, %v124_v42  ;;  %v161_v19 = vmul.f32 %v153_v35, %v148_v43  ;;  %v184_v20 = vmul.f32 %v579_v1, %v577_v60  ;;  %v611_v34 = vld [vmem:[#allocation8 + $0xa] sm:$0x1]  ;;  %v613_v35 = vld [vmem:[#allocation8 + $0xe] sm:$0x1] }
  0x5a   :  { %v208_v21 = vmul.f32 %v583_v3, %v581_v2  ;;  %v167_v24 = vadd.f32 %v159_v59, %v143_v12  ;;  %v144_v25 = vadd.f32 %v136_v5, %v120_v13  ;;  %v121_v26 = vadd.f32 %v113_v14, %v89_v7  ;;  %v619_v41 = vld [vmem:[#allocation8 + $0x7] sm:$0x1]  ;;  %v621_v42 = vld [vmem:[#allocation8 + $0xb] sm:$0x1]  ;;  %v627_v47 = vld [vmem:[#allocation8 + $0xf] sm:$0x1] }
  0x5b   :  { %174 = vst [vmem:[#allocation10 + $0x4] sm:$0x1] %v166_v11  ;;  %v232_v27 = vmul.f32 %v585_v9, %v225_v8  ;;  %v256_v31 = vmul.f32 %v587_v15, %v249_v10  ;;  %v185_v32 = vmul.f32 %v589_v16, %v577_v60  ;;  %v209_v33 = vmul.f32 %v591_v17, %v581_v2  ;;  %v179_v48 = vld [vmem:[#allocation5 + $0x4] sm:$0x1]  ;;  %v202_v49 = vld [vmem:[#allocation5 + $0x5] sm:$0x1] }
  0x5c   :  { %v216_v30 = vadd.f32 %v208_v21, %v184_v20  ;;  %175 = vst [vmem:[#allocation10 + $0x5] sm:$0x1] %v167_v24  ;;  %v168_v37 = vadd.f32 %v160_v6, %v144_v25  ;;  %v145_v38 = vadd.f32 %v137_v18, %v121_v26  ;;  %v233_v39 = vmul.f32 %v597_v22, %v225_v8  ;;  %v226_v54 = vld [vmem:[#allocation5 + $0x6] sm:$0x1]  ;;  %v250_v59 = vld [vmem:[#allocation5 + $0x7] sm:$0x1] }
  0x5d   :  { %v257_v40 = vmul.f32 %v599_v23, %v249_v10  ;;  %v217_v44 = vadd.f32 %v209_v33, %v185_v32  ;;  %v186_v45 = vmul.f32 %v602_v28, %v577_v60  ;;  %v210_v46 = vmul.f32 %v604_v29, %v581_v2  ;;  %s411_s17 = scalar_lea.vmem %s633_s1, 128 }
  0x5e   :  { %v240_v43 = vadd.f32 %v232_v27, %v216_v30  ;;  %176 = vst [vmem:[#allocation10 + $0x6] sm:$0x1] %v168_v37  ;;  %v169_v50 = vadd.f32 %v161_v19, %v145_v38  ;;  %v234_v51 = vmul.f32 %v611_v34, %v225_v8  ;;  %v258_v52 = vmul.f32 %v613_v35, %v249_v10  ;;  %p412_p4 = scmp.ne.s32.totalorder %s633_s1, %s411_s17  ;;  %p417_p6 = scmp.lt.s32.totalorder %s411_s17, %s411_s17 }
  0x5f   :  { %v187_v53 = vmul.f32 %v615_v36, %v577_v60  ;;  %v241_v56 = vadd.f32 %v233_v39, %v217_v44  ;;  %v218_v57 = vadd.f32 %v210_v46, %v186_v45  ;;  %v211_v58 = vmul.f32 %v619_v41, %v581_v2 }
  0x60   :  { %v264_v55 = vadd.f32 %v256_v31, %v240_v43  ;;  %177 = vst [vmem:[#allocation10 + $0x7] sm:$0x1] %v169_v50  ;;  %v235_v61 = vmul.f32 %v621_v42, %v225_v8  ;;  %v259_v62 = vmul.f32 %v627_v47, %v249_v10  ;;  %v188_v60 = vmul.f32 %v579_v1, %v179_v48  ;;  %p418_p7 = por %p417_p6, %p416_p5 }
  0x61   :  { %v212_v63 = vmul.f32 %v583_v3, %v202_v49  ;;  %v265_v0 = vadd.f32 %v257_v40, %v241_v56  ;;  %v242_v4 = vadd.f32 %v234_v51, %v218_v57  ;;  %v219_v5 = vadd.f32 %v211_v58, %v187_v53 }
  0x62   :  { %272 = vst [vmem:[#allocation11] sm:$0x1] %v264_v55  ;;  %v236_v6 = vmul.f32 %v585_v9, %v226_v54  ;;  %p419_p8 = pnand %p418_p7, %p412_p4 }
  0x64   :  { %422 = shalt.err (!%p419_p8)
}
  0x65   :  { %s423_s20 = scalar_lea.hbm %s694_s4, 128 }
  0x66   :  { %p424_p9 = scmp.ne.s32.totalorder %s694_s4, %s423_s20  ;;  %p427_p10 = scmp.lt.u32.totalorder %s423_s20, %s694_s4 }
  0x68   :  { %p429_p11 = pnand %p427_p10, %p424_p9 }
  0x6a   :  { %432 = shalt.err (!%p429_p11)
}
  0x6b   :  { %291 = dma.vmem_to_hbm [thread:$0]  %s633_s1, 128, %s694_s4, [#allocation4], %s467_s30, %s467_s30, %s468_s6   ;;  %v220_v1 = vadd.f32 %v212_v63, %v188_v60  ;;  %v260_v2 = vmul.f32 %v587_v15, %v250_v59  ;;  %v189_v3 = vmul.f32 %v589_v16, %v179_v48  ;;  %v213_v7 = vmul.f32 %v591_v17, %v202_v49  ;;  %273 = vst [vmem:[#allocation11 + $0x1] sm:$0x1] %v265_v0 }
  0x6c   :  { %v266_v8 = vadd.f32 %v258_v52, %v242_v4  ;;  %v243_v9 = vadd.f32 %v235_v61, %v219_v5  ;;  %v237_v10 = vmul.f32 %v597_v22, %v226_v54  ;;  %v261_v11 = vmul.f32 %v599_v23, %v250_v59  ;;  %s472_s4 = smov [#allocation11]  }
  0x6d   :  { %v244_v12 = vadd.f32 %v236_v6, %v220_v1  ;;  %v221_v13 = vadd.f32 %v213_v7, %v189_v3  ;;  %v190_v14 = vmul.f32 %v602_v28, %v179_v48  ;;  %v214_v18 = vmul.f32 %v604_v29, %v202_v49  ;;  %s297_s28 = sshll.u32 %s472_s4, 4  ;;  %s298_s28 = int_to_ptr.vmem [resolvable:$true] %s297_s28 }
  0x6e   :  { %274 = vst [vmem:[#allocation11 + $0x2] sm:$0x1] %v266_v8  ;;  %v267_v19 = vadd.f32 %v259_v62, %v243_v9  ;;  %v238_v15 = vmul.f32 %v611_v34, %v226_v54  ;;  %v262_v16 = vmul.f32 %v613_v35, %v250_v59  ;;  %v191_v17 = vmul.f32 %v615_v36, %v179_v48  ;;  %s433_s29 = scalar_lea.vmem %s298_s28, 128  ;;  %p438_p13 = scmp.lt.s32.totalorder %s298_s28, %s298_s28 }
  0x6f   :  { %v268_v20 = vadd.f32 %v260_v2, %v244_v12  ;;  %v245_v21 = vadd.f32 %v237_v10, %v221_v13  ;;  %v222_v24 = vadd.f32 %v214_v18, %v190_v14  ;;  %v215_v22 = vmul.f32 %v619_v41, %v202_v49  ;;  %p434_p12 = scmp.ne.s32.totalorder %s298_s28, %s433_s29  ;;  %p439_p0 = scmp.lt.s32.totalorder %s433_s29, %s433_s29 }
  0x70   :  { %275 = vst [vmem:[#allocation11 + $0x3] sm:$0x1] %v267_v19  ;;  %v239_v23 = vmul.f32 %v621_v42, %v226_v54  ;;  %v263_v28 = vmul.f32 %v627_v47, %v250_v59 }
  0x71   :  { %276 = vst [vmem:[#allocation11 + $0x4] sm:$0x1] %v268_v20  ;;  %v269_v25 = vadd.f32 %v261_v11, %v245_v21  ;;  %v246_v26 = vadd.f32 %v238_v15, %v222_v24  ;;  %v223_v27 = vadd.f32 %v215_v22, %v191_v17  ;;  %p440_p1 = por %p439_p0, %p438_p13 }
  0x73   :  { %277 = vst [vmem:[#allocation11 + $0x5] sm:$0x1] %v269_v25  ;;  %v270_v29 = vadd.f32 %v262_v16, %v246_v26  ;;  %v247_v30 = vadd.f32 %v239_v23, %v223_v27  ;;  %p441_p2 = pnand %p440_p1, %p434_p12 }
  0x75   :  { %278 = vst [vmem:[#allocation11 + $0x6] sm:$0x1] %v270_v29  ;;  %v271_v31 = vadd.f32 %v263_v28, %v247_v30 }
  0x77   :  { %279 = vst [vmem:[#allocation11 + $0x7] sm:$0x1] %v271_v31 }
  0x78   :  { %444 = shalt.err (!%p441_p2)
}
  0x79   :  { %s445_s7 = scalar_lea.hbm %s695_s5, 128 }
  0x7a   :  { %p446_p3 = scmp.ne.s32.totalorder %s695_s5, %s445_s7  ;;  %p449_p4 = scmp.lt.u32.totalorder %s445_s7, %s695_s5 }
  0x7c   :  { %p451_p5 = pnand %p449_p4, %p446_p3 }
  0x7e   :  { %454 = shalt.err (!%p451_p5)
}
  0x7f   :  { %303 = dma.vmem_to_hbm [thread:$0]  %s298_s28, 128, %s695_s5, [#allocation12], %s467_s30, %s467_s30, %s468_s6  }
  0x80   :  { %461 = dma.done.wait [#allocation4], 128  }
  0x81   :  { %462 = vsyncadd [#allocation4], 4294967168 }
  0x82   :  { %463 = dma.done.wait [#allocation12], 128  }
  0x83   :  { %464 = vsyncadd [#allocation12], 4294967168 }
  0x84   :  { %310 = vsyncpa [#allocation3], 1 }
  0x85   :  { %311 = vsyncpa [#allocation6], 1 }
  0x86   :  { %312 = vsyncpa [#allocation9], 1 }
  0x87   :  { %313 = vsyncpa [#allocation4], 1 }
  0x88   :  { %314 = vsyncpa [#allocation12], 1 }

</bundles_post_ra>
